<compile_context>
chip_gen: v5e
topology: v5e:2x2
jax: 0.10.0
libtpu: 0.0.40
codegen_flags: <defaults>
</compile_context>

<pallas_src>
import functools

import numpy as np
import jax
import jax.numpy as jnp
from jax import lax
from jax.experimental import pallas as pl
from jax.experimental.pallas import tpu as pltpu


def _round_up(x, m):
    return ((x + m - 1) // m) * m


def _vmem_capacity_bytes():
    try:
        info = pltpu.get_tpu_info()
        cap = getattr(info, "vmem_capacity_bytes", None)
        if cap:
            return int(cap)
    except Exception:
        pass
    return 64 * 1024 * 1024  # conservative default (v7x per-core VMEM)


# --------------------------- fast path: VMEM-resident table -------------------- #

def _fe_vmem_kernel(idx_ref, table_ref, out_ref, *, num_fields, emb_dim):
    """Gather via exact one-hot matmul against a VMEM-resident table.

    idx_ref:   VMEM (tb, F) int32 flat row indices (offsets folded, clipped).
    table_ref: VMEM (V, D) embedding table, resident across grid steps.
    out_ref:   VMEM (tb, F*D) lane-dense output tile.
    """
    tb = idx_ref.shape[0]
    V = table_ref.shape[0]
    idx = idx_ref[...]
    table = table_ref[...]
    iota_v = lax.broadcasted_iota(jnp.int32, (tb, V), 1)
    pieces = []
    for f in range(num_fields):                                   # F is small, static
        onehot = (idx[:, f:f + 1] == iota_v).astype(table.dtype)  # (tb, V), exact 0/1
        emb = jnp.dot(onehot, table,
                      precision=lax.Precision.HIGHEST,
                      preferred_element_type=jnp.float32)          # (tb, D)
        pieces.append(emb)
    out_ref[...] = jnp.concatenate(pieces, axis=-1).astype(out_ref.dtype)


# ------------------------------ HBM path: DMA gather --------------------------- #

def _fe_hbm_kernel(idx_ref, table_hbm, out_ref, sems, *, tb, num_fields, emb_dim):
    """Row gather via manual async DMA from an HBM-resident table.

    idx_ref:   SMEM (tb*F,) int32 flat row indices for this tile.
    table_hbm: (V, D) embedding table left in HBM (pl.ANY).
    out_ref:   VMEM (tb, F*D) lane-dense output tile.
    sems:      (F,) DMA semaphores shared across all rows of the tile.
    """
    F, D = num_fields, emb_dim
    unroll = min(4, tb)

    def issue(r, carry):
        for f in range(F):                                         # static inner loop
            row_id = idx_ref[r * F + f]
            pltpu.make_async_copy(
                table_hbm.at[pl.ds(row_id, 1), :],
                out_ref.at[pl.ds(r, 1), pl.ds(f * D, D)],
                sems.at[f],
            ).start()
        return carry

    def drain(r, carry):
        for f in range(F):
            pltpu.make_async_copy(
                table_hbm.at[pl.ds(0, 1), :],     # same transfer size; only sem matters
                out_ref.at[pl.ds(r, 1), pl.ds(f * D, D)],
                sems.at[f],
            ).wait()
        return carry

    lax.fori_loop(0, tb, issue, 0, unroll=unroll)   # all tb*F DMAs in flight
    lax.fori_loop(0, tb, drain, 0, unroll=unroll)


# ----------------------------------- wrapper ----------------------------------- #

def fe_forward(x, offsets, table, *, tb=256, force_hbm=False):
    """x: (B, F) int, offsets: (F,) int, table: (V, D) -> (B, F, D)."""
    B, F = x.shape
    V, D = table.shape
    itemsize = jnp.dtype(table.dtype).itemsize

    # Fold per-field offsets, clip for safety (bad index -> clamped row, never a wild DMA).
    flat_idx = jnp.clip(
        x.astype(jnp.int32) + offsets.astype(jnp.int32)[None, :], 0, V - 1)

    # Batch tile: multiple of 8; pad B to a multiple of tb; keep >=2 tiles when possible
    # so a "parallel" grid axis can shard across v7x's two TensorCores.
    tb = int(min(max(int(tb), 8), _round_up(B, 8)))
    tb = _round_up(tb, 8)
    if _round_up(B, tb) // tb < 2 and tb >= 16:
        tb = max(8, _round_up(tb // 2, 8))
    B_pad = _round_up(B, tb)
    if B_pad != B:
        flat_idx = jnp.concatenate(
            [flat_idx, jnp.zeros((B_pad - B, F), jnp.int32)], axis=0)
    nb = B_pad // tb

    vmem_cap = _vmem_capacity_bytes()
    table_bytes = V * D * itemsize
    out_tile_bytes = tb * F * D * itemsize
    idx_tile_bytes = tb * 128 * 4                      # int32 idx tile, lane-padded
    fast_bytes = 2 * table_bytes + 2 * out_tile_bytes + 2 * idx_tile_bytes
    use_fast = (not force_hbm) and fast_bytes <= int(0.75 * vmem_cap)

    if use_fast:
        vmem_limit = int(min(int(0.9 * vmem_cap),
                             max(fast_bytes + (8 << 20), 32 << 20)))
        kernel = functools.partial(_fe_vmem_kernel, num_fields=F, emb_dim=D)
        out = pl.pallas_call(
            kernel,
            out_shape=jax.ShapeDtypeStruct((B_pad, F * D), table.dtype),
            grid=(nb,),
            in_specs=[
                pl.BlockSpec((tb, F), lambda i: (i, 0)),   # per-tile indices (VMEM)
                pl.BlockSpec((V, D), lambda i: (0, 0)),     # table resident in VMEM
            ],
            out_specs=pl.BlockSpec((tb, F * D), lambda i: (i, 0)),
            compiler_params=pltpu.CompilerParams(
                dimension_semantics=("parallel",),
                vmem_limit_bytes=vmem_limit,
            ),
        )(flat_idx, table)
    else:
        kernel = functools.partial(_fe_hbm_kernel, tb=tb, num_fields=F, emb_dim=D)
        out = pl.pallas_call(
            kernel,
            out_shape=jax.ShapeDtypeStruct((B_pad, F * D), table.dtype),
            grid=(nb,),
            in_specs=[
                pl.BlockSpec((tb * F,), lambda i: (i,),
                             memory_space=pltpu.MemorySpace.SMEM),  # flat idx tile
                pl.BlockSpec(memory_space=pl.ANY),                  # table stays in HBM
            ],
            out_specs=pl.BlockSpec((tb, F * D), lambda i: (i, 0)),
            scratch_shapes=[pltpu.SemaphoreType.DMA((F,))],
            compiler_params=pltpu.CompilerParams(
                dimension_semantics=("parallel",),
            ),
        )(flat_idx.reshape(B_pad * F), table)

    # (B_pad, F*D) -> (B, F, D): contiguous reshape + slice, no data movement in kernel.
    return out.reshape(B_pad, F, D)[:B]


if __name__ == "__main__":
    key = jax.random.PRNGKey(0)

    field_dims = (3, 5, 7, 9)          # small synthetic field cardinalities
    embedding_dim = 32
    B = 16
    F = len(field_dims)
    V = int(sum(field_dims))

    # offsets = (0, cumsum(field_dims[:-1]))
    offsets = jnp.asarray(
        np.concatenate([[0], np.cumsum(field_dims[:-1])]).astype(np.int32))

    # xavier_uniform_ init for the (V, D) embedding table
    k_w, *k_idx = jax.random.split(key, 1 + F)
    limit = float(np.sqrt(6.0 / (V + embedding_dim)))
    table = jax.random.uniform(
        k_w, (V, embedding_dim), dtype=jnp.float32, minval=-limit, maxval=limit)

    # per-field indices in [0, field_dims[f])
    cols = [
        jax.random.randint(k_idx[f], (B, 1), 0, field_dims[f], dtype=jnp.int32)
        for f in range(F)
    ]
    x = jnp.concatenate(cols, axis=1)  # (B, F) int32

    # plain-JAX reference
    ref = jnp.take(table, x + offsets[None, :], axis=0)

    # Fast path (table fits in VMEM).
    out_fast = jax.block_until_ready(fe_forward(x, offsets, table))
    assert out_fast.shape == (B, F, embedding_dim)
    np.testing.assert_allclose(np.asarray(out_fast), np.asarray(ref),
                               rtol=1e-6, atol=1e-6)

    # HBM DMA-gather path (forced, exercises the large-table fallback).
    out_hbm = jax.block_until_ready(fe_forward(x, offsets, table, force_hbm=True))
    assert out_hbm.shape == (B, F, embedding_dim)
    np.testing.assert_array_equal(np.asarray(out_hbm), np.asarray(ref))

    print("KERNEL_OK")
</pallas_src>

<mosaic_0001>
module attributes {stable_mosaic.version = 11 : i64} {
  func.func @_fe_vmem_kernel(%arg0: i32, %arg1: memref<8x4xi32, #tpu.memory_space<vmem>>, %arg2: memref<24x32xf32, #tpu.memory_space<vmem>>, %arg3: memref<8x128xf32, #tpu.memory_space<vmem>>) attributes {dimension_semantics = [#tpu.dimension_semantics<parallel>], iteration_bounds = array<i64: 2>, scalar_prefetch = 0 : i64, scratch_operands = 0 : i64, tpu.core_type = #tpu.core_type<tc>, window_params = [{transform_indices = @transform_0, window_bounds = array<i64: 8, 4>}, {pipeline_mode = #tpu.pipeline_mode<synchronous>, transform_indices = @transform_1, window_bounds = array<i64: 24, 32>}, {transform_indices = @transform_2, window_bounds = array<i64: 8, 128>}]} {
    %c0 = arith.constant 0 : index
    %c0_0 = arith.constant 0 : index
    %0 = vector.load %arg1[%c0, %c0_0] : memref<8x4xi32, #tpu.memory_space<vmem>>, vector<8x4xi32>
    %c0_1 = arith.constant 0 : index
    %c0_2 = arith.constant 0 : index
    %1 = vector.load %arg2[%c0_1, %c0_2] : memref<24x32xf32, #tpu.memory_space<vmem>>, vector<24x32xf32>
    %2 = tpu.iota {dimensions = array<i32: 1>} : vector<8x24xi32>
    %3 = vector.extract_strided_slice %0 {offsets = [0, 0], sizes = [8, 1], strides = [1, 1]} : vector<8x4xi32> to vector<8x1xi32>
    %4 = vector.broadcast %3 : vector<8x1xi32> to vector<8x24xi32>
    %5 = arith.cmpi eq, %4, %2 : vector<8x24xi32>
    %6 = arith.extui %5 : vector<8x24xi1> to vector<8x24xi32>
    %7 = arith.sitofp %6 : vector<8x24xi32> to vector<8x24xf32>
    %cst = arith.constant dense<0.000000e+00> : vector<8x32xf32>
    %8 = tpu.matmul %7, %1, %cst {dimension_numbers = #tpu.dot_dimension_numbers<[1], [0], [0], [1], [0, 0, 1, 1], [], []>, precision = #tpu.contract_precision<fp32>} : vector<8x24xf32>, vector<24x32xf32>, vector<8x32xf32> -> vector<8x32xf32>
    %9 = vector.extract_strided_slice %0 {offsets = [0, 1], sizes = [8, 1], strides = [1, 1]} : vector<8x4xi32> to vector<8x1xi32>
    %10 = vector.broadcast %9 : vector<8x1xi32> to vector<8x24xi32>
    %11 = arith.cmpi eq, %10, %2 : vector<8x24xi32>
    %12 = arith.extui %11 : vector<8x24xi1> to vector<8x24xi32>
    %13 = arith.sitofp %12 : vector<8x24xi32> to vector<8x24xf32>
    %cst_3 = arith.constant dense<0.000000e+00> : vector<8x32xf32>
    %14 = tpu.matmul %13, %1, %cst_3 {dimension_numbers = #tpu.dot_dimension_numbers<[1], [0], [0], [1], [0, 0, 1, 1], [], []>, precision = #tpu.contract_precision<fp32>} : vector<8x24xf32>, vector<24x32xf32>, vector<8x32xf32> -> vector<8x32xf32>
    %15 = vector.extract_strided_slice %0 {offsets = [0, 2], sizes = [8, 1], strides = [1, 1]} : vector<8x4xi32> to vector<8x1xi32>
    %16 = vector.broadcast %15 : vector<8x1xi32> to vector<8x24xi32>
    %17 = arith.cmpi eq, %16, %2 : vector<8x24xi32>
    %18 = arith.extui %17 : vector<8x24xi1> to vector<8x24xi32>
    %19 = arith.sitofp %18 : vector<8x24xi32> to vector<8x24xf32>
    %cst_4 = arith.constant dense<0.000000e+00> : vector<8x32xf32>
    %20 = tpu.matmul %19, %1, %cst_4 {dimension_numbers = #tpu.dot_dimension_numbers<[1], [0], [0], [1], [0, 0, 1, 1], [], []>, precision = #tpu.contract_precision<fp32>} : vector<8x24xf32>, vector<24x32xf32>, vector<8x32xf32> -> vector<8x32xf32>
    %21 = vector.extract_strided_slice %0 {offsets = [0, 3], sizes = [8, 1], strides = [1, 1]} : vector<8x4xi32> to vector<8x1xi32>
    %22 = vector.broadcast %21 : vector<8x1xi32> to vector<8x24xi32>
    %23 = arith.cmpi eq, %22, %2 : vector<8x24xi32>
    %24 = arith.extui %23 : vector<8x24xi1> to vector<8x24xi32>
    %25 = arith.sitofp %24 : vector<8x24xi32> to vector<8x24xf32>
    %cst_5 = arith.constant dense<0.000000e+00> : vector<8x32xf32>
    %26 = tpu.matmul %25, %1, %cst_5 {dimension_numbers = #tpu.dot_dimension_numbers<[1], [0], [0], [1], [0, 0, 1, 1], [], []>, precision = #tpu.contract_precision<fp32>} : vector<8x24xf32>, vector<24x32xf32>, vector<8x32xf32> -> vector<8x32xf32>
    %27 = tpu.concatenate %8, %14, %20, %26 in 1 : vector<8x32xf32>, vector<8x32xf32>, vector<8x32xf32>, vector<8x32xf32> -> vector<8x128xf32>
    %c0_6 = arith.constant 0 : index
    %c0_7 = arith.constant 0 : index
    %28 = vector.load %arg3[%c0_6, %c0_7] : memref<8x128xf32, #tpu.memory_space<vmem>>, vector<8x128xf32>
    tpu.vector_store %arg3[%c0_6, %c0_7], %27 {strides = array<i32>} : memref<8x128xf32, #tpu.memory_space<vmem>>, vector<8x128xf32>,
    return
  }
  func.func @transform_0(%arg0: i32) -> (i32, i32) {
    %c0_i32 = arith.constant 0 : i32
    %c0_i32_0 = arith.constant 0 : i32
    return %arg0, %c0_i32 : i32, i32
  }
  func.func @transform_1(%arg0: i32) -> (i32, i32) {
    %c0_i32 = arith.constant 0 : i32
    %c0_i32_0 = arith.constant 0 : i32
    %c0_i32_1 = arith.constant 0 : i32
    return %c0_i32, %c0_i32_0 : i32, i32
  }
  func.func @transform_2(%arg0: i32) -> (i32, i32) {
    %c0_i32 = arith.constant 0 : i32
    %c0_i32_0 = arith.constant 0 : i32
    return %arg0, %c0_i32 : i32, i32
  }
}

</mosaic_0001>

<bundles_post_ra>
// kernel: tpu_custom_call.1
= control target key start
LH: loop header
LB: loop body
LE: loop exit
PB: predicated region body
PF: predicated region fallthrough
CT: control target
= control target key end

     0   :  { %7 = vsyncpa [#allocation3], 0  ;;  %s1435_s0 = inlined_call_operand.vmem [shape: s32[16,4], index: 0, kind: input, shape index: {}]   ;;  %s1436_s1 = inlined_call_operand.hbm [shape: f32[24,32], index: 1, kind: input, shape index: {}]   ;;  %s1437_s2 = inlined_call_operand.hbm [shape: f32[16,128], index: 2, kind: output, shape index: {}]  }
   0x1   :  { %8 = vsyncpa [#allocation4], 0 }
   0x2   :  { %10 = vsyncpa [#allocation4 + $0x1], 0  ;;  %s1210_s9 = smov 0   ;;  %s1212_s10 = smov 0  }
   0x3   :  { %s1214_s11 = smov 0   ;;  %s1216_s12 = smov 0  }
   0x4 LB: > { %s1231_s13 = sadd.s32 4294967295, %s1182_s12   ;;  %s993_s14 = sadd.s32 4294967294, %s1182_s12   ;;  %s1182_s12 = sphi %s1216_s12, %s1443_s12   ;;  %s1178_s11 = sphi %s1214_s11, %s1442_s11   ;;  %s1174_s10 = sphi %s1212_s10, %s1441_s10   ;;  %s1170_s9 = sphi %s1210_s9, %s1440_s9  }
   0x5   : > { %s1235_s15 = sadd.s32 1, %s1182_s12   ;;  %s70_s16 = sadd.s32 1, %s1178_s11 }
   0x6   : > { %s67_s17 = ssub.s32 %s1182_s12, %s1235_s15  ;;  %p80_p0 = scmp.ne.s32.totalorder %s1178_s11, %s1174_s10 }
   0x7   : > { %p68_p1 = scmp.eq.s32.totalorder %s67_s17, 0  ;;  %p81_p2 = scmp.eq.s32.totalorder %s1231_s13, 1 }
   0x8   : > { %p86_p3 = scmp.ne.s32.totalorder %s1174_s10, %s1170_s9  ;;  %p87_p4 = scmp.eq.s32.totalorder %s993_s14, 1 }
   0x9   : > { %s1246_s18 = scalar_select %p68_p1, %s1178_s11, %s70_s16  }
   0xa   : > { %p1248_p5 = por %p81_p2, %p80_p0  ;;  %p1252_p6 = por %p87_p4, %p86_p3 }
   0xb   : > { %p994_p7 = scmp.ge.s32.totalorder %s1182_s12, 1  ;;  %p94_p8 = scmp.lt.s32.totalorder %s1182_s12, 3 }
   0xc   : > { %p1035_p9 = scmp.eq.s32.totalorder %s1231_s13, 0  ;;  %s105_s23 = sshll.u32 %s1436_s1, 4  ;;  %s106_s23 = int_to_ptr.hbm [resolvable:$true] %s105_s23 }
   0xd   : > { %p95_p10 = pnand %p994_p7, %p94_p8  ;;  %s1184_s24 = smov [#allocation2]  }
   0xe   : > { %s107_s25 = sshll.u32 %s1184_s24, 4  ;;  %s1185_s26 = smov 128   ;;  %s108_s25 = int_to_ptr.vmem [resolvable:$true] %s107_s25 }
   0xf   : > { %p1027_p11 = pneg %p95_p10  ;;  %s1186_s27 = smov 8  }
  0x10   : > { %130 = sbr.rel (%p95_p10) target bundleno = 451 (0x1c3), region = 28 }
  0x11   : > { %p1028_p12 = pnand %p1035_p9, %p1027_p11 }
  0x13   : > { %1030 = dma.hbm_to_vmem [thread:$0]  (!%p1028_p12), %s106_s23, 384, %s108_s25, [#allocation3], %s1185_s26, %s1185_s26, %s1186_s27  }
  0x15   : > { %1161 = dma.done.wait (%p1035_p9), [#allocation3], 384  }
  0x16   : > { %1163 = vsyncadd (%p1035_p9), [#allocation3], 4294966912  ;;  %p152_p13 = scmp.lt.s32.totalorder %s1231_s13, 1  ;;  %v1187_v0 = vmov 0   ;;  %v1188_v1 = vmov 2   ;;  %v159_v3 = vld [vmem:[#allocation2 + $0x10] sm:$0xff]  ;;  %v160_v23 = vlaneseq }
  0x17   : > { %1081 = vset.pattern.permute.xlu0 %v1187_v0  ;;  %1083 = vset.pattern.permute.xlu1 %v1188_v1  ;;  %v158_v4 = vld [vmem:[#allocation2 + $0x8] sm:$0xff]  ;;  %v1273_v5 = vand.u32 4294901760, %v159_v3  ;;  %v1189_v13 = vmov 1   ;;  %v1190_v14 = vmov 3   ;;  %v157_v17 = vld [vmem:[#allocation2] sm:$0xff]  ;;  %vm168_vm0 = vcmask 195584  }
  0x18   : > { %s153_s28 = scalar_select %p152_p13, %s1231_s13, 1  ;;  %v1275_v6 = vand.u32 4294901760, %v158_v4  ;;  %v1305_v18 = vand.u32 4294901760, %v157_v17  ;;  %v161_v24 = vand.u32 127, %v160_v23  ;;  %v1191_v26 = vmov 0.0  }
  0x19   : > { %v1278_v7 = vsub.f32 %v159_v3, %v1273_v5  ;;  %278 = vmatpush.msra.mxu3 %v1273_v5  ;;  %186 = vmatpush.msra.mxu0 %v1273_v5  ;;  %s1192_s5 = smov 32   ;;  %s1193_s6 = smov 64   ;;  %vm899_vm5 = vcmask 261120   ;;  %vm901_vm6 = vcmask 523264   ;;  %vm903_vm7 = vcmask 785408  }
  0x1a   : > { %s1000_s29 = sshll.u32 %s153_s28, 3  ;;  %v1281_v8 = vsub.f32 %v158_v4, %v1275_v6  ;;  %v1308_v19 = vsub.f32 %v157_v17, %v1305_v18  ;;  %s1194_s7 = smov 96  }
  0x1b   : > { %s155_s4 = scalar_lea.vmem %s1435_s0, %s1000_s29  ;;  %v1286_v9 = vand.u32 4294901760, %v1278_v7  ;;  %251 = vmatpush.msra.mxu2 %v1278_v7  ;;  %280 = vmatpush.msra.mxu3 %v1275_v6  ;;  %s149_s8 = sand.u32 1, %s1174_s10  }
  0x1c   : > { %v156_v2 = vld [vmem:[%s155_s4] sm:$0xff]  ;;  %v1289_v10 = vand.u32 4294901760, %v1281_v8  ;;  %188 = vmatpush.msra.mxu0 %v1275_v6  ;;  %v1315_v20 = vand.u32 4294901760, %v1308_v19  ;;  %s999_s14 = sshll.u32 %s149_s8, 3  ;;  %s1018_s16 = sshll.u32 %s1231_s13, 3 }
  0x1d   : > { %163 = vperm.xlu0 %1081, %v156_v2   ;;  %526 = vperm.xlu1 %1083, %v156_v2   ;;  %v216_v11 = vsub.f32 %v1278_v7, %v1286_v9  ;;  %s917_s22 = scalar_lea.hbm %s1437_s2, %s1018_s16  ;;  %s151_s23 = scalar_lea.vmem [#allocation5], %s999_s14 }
  0x1e   : > { %v222_v12 = vsub.f32 %v1281_v8, %v1289_v10  ;;  %254 = vmatpush.msra.mxu2 %v1281_v8  ;;  %282 = vmatpush.msra.mxu3 %v1305_v18  ;;  %v228_v21 = vsub.f32 %v1308_v19, %v1315_v20  ;;  %s919_s24 = sshll.u32 %s151_s23, 4  ;;  %s921_s25 = sshll.u32 %s917_s22, 4  ;;  %s920_s24 = int_to_ptr.vmem [resolvable:$true] %s919_s24  ;;  %s922_s25 = int_to_ptr.hbm [resolvable:$true] %s921_s25 }
  0x1f   : > { %v1299_v15 = vand.u32 4294901760, %v216_v11  ;;  %190 = vmatpush.msra.mxu0 %v1305_v18  ;;  %s907_s13 = scalar_lea.sflag [#allocation4], %s149_s8  ;;  %s1130_s26 = sshra.s32 %s922_s25, 4  ;;  %s1131_s26 = int_to_ptr.hbm [resolvable:$true] %s1130_s26 }
  0x20   : > { %v1301_v16 = vand.u32 4294901760, %v222_v12  ;;  %257 = vmatpush.msra.mxu2 %v1308_v19  ;;  %v1324_v22 = vand.u32 4294901760, %v228_v21  ;;  %s1132_s27 = scalar_lea.hbm %s1131_s26, 8  ;;  %s1136_s30 = scalar_lea.hbm %s1437_s2, 16 }
  0x21   : > { %218 = vmatpush.msra.mxu1 %v1299_v15  ;;  %399 = vmatpush.msrb.mxu3 %v1299_v15  ;;  %p1133_p0 = scmp.ne.s32.totalorder %s1131_s26, %s1132_s27  ;;  %p1137_p3 = scmp.lt.s32.totalorder %s1131_s26, %s1437_s2 }
  0x22   : > { %306 = vmatpush.msrb.mxu0 %v1286_v9  ;;  %367 = vmatpush.msrb.mxu2 %v1273_v5  ;;  %p1138_p4 = scmp.lt.s32.totalorder %s1136_s30, %s1132_s27 }
  0x23   : > { %224 = vmatpush.msra.mxu1 %v1301_v16  ;;  %405 = vmatpush.msrb.mxu3 %v1301_v16  ;;  %p1134_p1 = pnand %p1133_p0, %p1248_p5 }
  0x24   : > { %310 = vmatpush.msrb.mxu0 %v1289_v10  ;;  %369 = vmatpush.msrb.mxu2 %v1275_v6  ;;  %p1139_p7 = por %p1138_p4, %p1137_p3 }
  0x25   : > { %1082 = vset.pattern.permute.xlu0 %v1189_v13  ;;  %1084 = vset.pattern.permute.xlu1 %v1190_v14  ;;  %p1135_p2 = pneg %p1134_p1 }
  0x26   : > { %345 = vperm.xlu0 %1082, %v156_v2   ;;  %707 = vperm.xlu1 %1084, %v156_v2  }
  0x27   : > { %314 = vmatpush.msrb.mxu0 %v1315_v20  ;;  %371 = vmatpush.msrb.mxu2 %v1305_v18  ;;  %p1140_p8 = pnand %p1139_p7, %p1135_p2 }
  0x28   : > { %230 = vmatpush.msra.mxu1 %v1324_v22  ;;  %411 = vmatpush.msrb.mxu3 %v1324_v22 }
  0x2a   : > { %334 = vmatpush.msrb.mxu1 %v1273_v5 }
  0x2c   : > { %336 = vmatpush.msrb.mxu1 %v1275_v6 }
  0x2e   : > { %1085 = vset.pattern.permute.xlu0 %v1190_v14  ;;  %338 = vmatpush.msrb.mxu1 %v1305_v18 }
  0x8f   : > { %v164_v25 = vpop.permute.xlu0 %163  ;;  %v527_v33 = vpop.permute.xlu1 %526 }
  0x90   : > { %vm165_vm1 = vcmp.eq.s32.totalorder %v164_v25, %v161_v24  ;;  %vm528_vm3 = vcmp.eq.s32.totalorder %v527_v33, %v161_v24 }
  0x91   : > { %v1001_v27 = vsel %vm165_vm1, 1.0, %v1191_v26  ;;  %v1351_v39 = vsel %vm528_vm3, 1.0, %v1191_v26 }
  0x92   : > { %1002 = vmatmul.msk.f32.vlgmr.msra.gmra.mxu1 %vm168_vm0, %v1001_v27  ;;  %v170_v28 = vsel %vm168_vm0, %v1001_v27, 0  ;;  %v532_v42 = vsel %vm168_vm0, %v1351_v39, 0 }
  0x93   : > { %v192_v29 = vsub.f32 %v170_v28, %v170_v28  ;;  %459 = vmatpush.msra.mxu1 %v1273_v5  ;;  %v554_v44 = vsub.f32 %v532_v42, %v532_v42 }
  0x95   : > { %260 = vmatmul.f32.vlgmr.msra.gmra.mxu2 %v192_v29  ;;  %v193_v30 = vand.u32 4294901760, %v192_v29  ;;  %461 = vmatpush.msra.mxu1 %v1275_v6  ;;  %v555_v46 = vand.u32 4294901760, %v554_v44 }
  0x96   : > { %487 = vmatpush.msra.mxu2 %v1286_v9 }
  0x97   : > { %286 = vmatmul.f32.vlgmr.msra.gmra.mxu3 %v193_v30  ;;  %v194_v31 = vsub.f32 %v192_v29, %v193_v30  ;;  %463 = vmatpush.msra.mxu1 %v1305_v18  ;;  %v556_v48 = vsub.f32 %v554_v44, %v555_v46 }
  0x98   : > { %v346_v32 = vpop.permute.xlu0 %345  ;;  %515 = vmatpush.msra.mxu3 %v1273_v5  ;;  %491 = vmatpush.msra.mxu2 %v1289_v10  ;;  %v708_v43 = vpop.permute.xlu1 %707 }
  0x99   : > { %vm347_vm2 = vcmp.eq.s32.totalorder %v346_v32, %v161_v24  ;;  %v195_v34 = vand.u32 4294901760, %v194_v31  ;;  %vm709_vm4 = vcmp.eq.s32.totalorder %v708_v43, %v161_v24  ;;  %v557_v50 = vand.u32 4294901760, %v556_v48 }
  0x9a   : > { %v1005_v35 = vsel %vm347_vm2, 1.0, %v1191_v26  ;;  %1004 = vmatmul.msk.f32.vlgmr.msrb.gmra.mxu1 %vm168_vm0, %v1001_v27  ;;  %517 = vmatpush.msra.mxu3 %v1275_v6  ;;  %v1013_v45 = vsel %vm709_vm4, 1.0, %v1191_v26 }
  0x9b   : > { %v351_v36 = vsel %vm168_vm0, %v1005_v35, 0  ;;  %196 = vmatmul.f32.vlgmr.msra.gmra.mxu0 %v195_v34  ;;  %580 = vmatpush.msrb.mxu1 %v1299_v15  ;;  %v713_v47 = vsel %vm168_vm0, %v1013_v45, 0 }
  0x9c   : > { %v373_v37 = vsub.f32 %v351_v36, %v351_v36  ;;  %432 = vmatpush.msra.mxu0 %v1278_v7  ;;  %519 = vmatpush.msra.mxu3 %v1305_v18  ;;  %v735_v49 = vsub.f32 %v713_v47, %v713_v47 }
  0x9d   : > { %586 = vmatpush.msrb.mxu1 %v1301_v16  ;;  %495 = vmatpush.msra.mxu2 %v1315_v20 }
  0x9e   : > { %v374_v38 = vand.u32 4294901760, %v373_v37  ;;  %435 = vmatpush.msra.mxu0 %v1281_v8  ;;  %v736_v51 = vand.u32 4294901760, %v735_v49 }
  0x9f   : > { %1006 = vmatmul.msk.f32.vlgmr.msrb.gmra.mxu3 %vm168_vm0, %v1005_v35  ;;  %592 = vmatpush.msrb.mxu1 %v1324_v22 }
  0xa0   : > { %v375_v40 = vsub.f32 %v373_v37, %v374_v38  ;;  %438 = vmatpush.msra.mxu0 %v1308_v19  ;;  %640 = vmatpush.msrb.mxu3 %v1273_v5  ;;  %v737_v52 = vsub.f32 %v735_v49, %v736_v51 }
  0xa2   : > { %467 = vmatmul.f32.vlgmr.msra.gmra.mxu1 %v374_v38  ;;  %v376_v41 = vand.u32 4294901760, %v375_v40  ;;  %642 = vmatpush.msrb.mxu3 %v1275_v6  ;;  %v738_v53 = vand.u32 4294901760, %v737_v52 }
  0xa3   : > { %1003 = vmatmul.msk.f32.vlgmr.msrb.gmra.mxu0 %vm168_vm0, %v1001_v27  ;;  %696 = vmatpush.msra.mxu1 %v1273_v5 }
  0xa4   : > { %377 = vmatmul.f32.vlgmr.msrb.gmra.mxu2 %v376_v41  ;;  %548 = vmatpush.msrb.mxu0 %v1273_v5 }
  0xa5   : > { %613 = vmatpush.msrb.mxu2 %v1278_v7  ;;  %644 = vmatpush.msrb.mxu3 %v1305_v18 }
  0xa6   : > { %698 = vmatpush.msra.mxu1 %v1275_v6  ;;  %550 = vmatpush.msrb.mxu0 %v1275_v6 }
  0xa7   : > { %1008 = vmatmul.msk.f32.vlgmr.msra.gmra.mxu3 %vm168_vm0, %v1005_v35  ;;  %616 = vmatpush.msrb.mxu2 %v1281_v8 }
  0xa8   : > { %700 = vmatpush.msra.mxu1 %v1305_v18  ;;  %552 = vmatpush.msrb.mxu0 %v1305_v18 }
  0xa9   : > { %619 = vmatpush.msrb.mxu2 %v1308_v19  ;;  %761 = vmatpush.msra.mxu3 %v1299_v15 }
  0xaa   : > { %1010 = vmatmul.msk.f32.vlgmr.msrb.gmra.mxu1 %vm168_vm0, %v1351_v39 }
  0xab   : > { %441 = vmatmul.f32.vlgmr.msra.gmra.mxu0 %v373_v37  ;;  %767 = vmatpush.msra.mxu3 %v1301_v16 }
  0xac   : > { %1007 = vmatmul.msk.f32.vlgmr.msra.gmra.mxu2 %vm168_vm0, %v1005_v35  ;;  %821 = vmatpush.msrb.mxu1 %v1273_v5 }
  0xad   : > { %729 = vmatpush.msra.mxu2 %v1273_v5  ;;  %668 = vmatpush.msra.mxu0 %v1286_v9 }
  0xae   : > { %773 = vmatpush.msra.mxu3 %v1324_v22  ;;  %823 = vmatpush.msrb.mxu1 %v1275_v6 }
  0xaf   : > { %648 = vmatmul.f32.vlgmr.msrb.gmra.mxu3 %v555_v46  ;;  %731 = vmatpush.msra.mxu2 %v1275_v6 }
  0xb0   : > { %672 = vmatpush.msra.mxu0 %v1289_v10  ;;  %825 = vmatpush.msrb.mxu1 %v1305_v18 }
  0xb1   : > { %733 = vmatpush.msra.mxu2 %v1305_v18  ;;  %877 = vmatpush.msrb.mxu3 %v1273_v5 }
  0xb2   : > { %1012 = vmatmul.msk.f32.vlgmr.msra.gmra.mxu1 %vm168_vm0, %v1351_v39  ;;  %676 = vmatpush.msra.mxu0 %v1315_v20 }
  0xb3   : > { %558 = vmatmul.f32.vlgmr.msrb.gmra.mxu0 %v557_v50  ;;  %879 = vmatpush.msrb.mxu3 %v1275_v6 }
  0xb4   : > { %622 = vmatmul.f32.vlgmr.msrb.gmra.mxu2 %v554_v44  ;;  %794 = vmatpush.msrb.mxu0 %v1278_v7 }
  0xb5   : > { %849 = vmatpush.msrb.mxu2 %v1286_v9  ;;  %881 = vmatpush.msrb.mxu3 %v1305_v18 }
  0xb6   : > { %797 = vmatpush.msrb.mxu0 %v1281_v8 }
  0xb7   : > { %1014 = vmatmul.msk.f32.vlgmr.msra.gmra.mxu3 %vm168_vm0, %v1013_v45  ;;  %853 = vmatpush.msrb.mxu2 %v1289_v10 }
  0xb8   : > { %800 = vmatpush.msrb.mxu0 %v1308_v19 }
  0xb9   : > { %857 = vmatpush.msrb.mxu2 %v1315_v20 }
  0xba   : > { %829 = vmatmul.f32.vlgmr.msrb.gmra.mxu1 %v736_v51 }
  0xbb   : > { %1011 = vmatmul.msk.f32.vlgmr.msra.gmra.mxu0 %vm168_vm0, %v1351_v39 }
  0xbc   : > { %739 = vmatmul.f32.vlgmr.msra.gmra.mxu2 %v738_v53 }
  0xbf   : > { %1016 = vmatmul.msk.f32.vlgmr.msrb.gmra.mxu3 %vm168_vm0, %v1013_v45 }
  0xc3   : > { %803 = vmatmul.f32.vlgmr.msrb.gmra.mxu0 %v735_v49 }
  0xc4   : > { %1015 = vmatmul.msk.f32.vlgmr.msrb.gmra.mxu2 %vm168_vm0, %v1013_v45 }
 0x10f   : > { %v233_v54 = vpop.f32.mrf.mxu1 }
 0x117   : > { %v341_v60 = vpop.f32.mrf.mxu1 }
 0x118   : > { %v197_v55 = vpop.f32.mrf.mxu0  ;;  %v261_v57 = vpop.f32.mrf.mxu2 }
 0x119   : > { %v234_v56 = vadd.f32 %v233_v54, %v197_v55 }
 0x11a   : > { %v287_v58 = vpop.f32.mrf.mxu3 }
 0x11b   : > { %v262_v59 = vadd.f32 %v261_v57, %v234_v56 }
 0x11d   : > { %v288_v61 = vadd.f32 %v287_v58, %v262_v59 }
 0x11f   : > { %v468_v2 = vpop.f32.mrf.mxu1 }
 0x120   : > { %v317_v62 = vpop.f32.mrf.mxu0 }
 0x121   : > { %v318_v63 = vadd.f32 %v317_v62, %v288_v61 }
 0x122   : > { %v414_v0 = vpop.f32.mrf.mxu3 }
 0x123   : > { %v342_v1 = vadd.f32 %v341_v60, %v318_v63 }
 0x127   : > { %v378_v3 = vpop.f32.mrf.mxu2  ;;  %v595_v12 = vpop.f32.mrf.mxu1 }
 0x128   : > { %v415_v4 = vadd.f32 %v414_v0, %v378_v3  ;;  %v442_v5 = vpop.f32.mrf.mxu0 }
 0x12a   : > { %v443_v6 = vadd.f32 %v442_v5, %v415_v4  ;;  %v522_v7 = vpop.f32.mrf.mxu3 }
 0x12c   : > { %v469_v8 = vadd.f32 %v468_v2, %v443_v6 }
 0x12f   : > { %v498_v9 = vpop.f32.mrf.mxu2  ;;  %v703_v20 = vpop.f32.mrf.mxu1 }
 0x130   : > { %v499_v10 = vadd.f32 %v498_v9, %v469_v8  ;;  %v559_v11 = vpop.f32.mrf.mxu0 }
 0x131   : > { %v596_v15 = vadd.f32 %v595_v12, %v559_v11 }
 0x132   : > { %v523_v13 = vadd.f32 %v522_v7, %v499_v10  ;;  %v649_v14 = vpop.f32.mrf.mxu3 }
 0x134   : > { %888 = vrot.lane.b32.xlu2 %v523_v13, %s1192_s5 }
 0x137   : > { %v623_v16 = vpop.f32.mrf.mxu2  ;;  %v830_v28 = vpop.f32.mrf.mxu1 }
 0x138   : > { %v624_v17 = vadd.f32 %v623_v16, %v596_v15  ;;  %v679_v18 = vpop.f32.mrf.mxu0 }
 0x13a   : > { %v650_v19 = vadd.f32 %v649_v14, %v624_v17  ;;  %v776_v23 = vpop.f32.mrf.mxu3 }
 0x13c   : > { %v680_v21 = vadd.f32 %v679_v18, %v650_v19 }
 0x13e   : > { %v704_v22 = vadd.f32 %v703_v20, %v680_v21 }
 0x13f   : > { %v740_v24 = vpop.f32.mrf.mxu2 }
 0x140   : > { %v777_v25 = vadd.f32 %v776_v23, %v740_v24  ;;  %v804_v26 = vpop.f32.mrf.mxu0  ;;  %892 = vrot.lane.b32.xlu2 %v704_v22, %s1193_s6 }
 0x142   : > { %v805_v27 = vadd.f32 %v804_v26, %v777_v25  ;;  %v884_v32 = vpop.f32.mrf.mxu3 }
 0x144   : > { %v831_v29 = vadd.f32 %v830_v28, %v805_v27 }
 0x147   : > { %v860_v30 = vpop.f32.mrf.mxu2 }
 0x148   : > { %v861_v31 = vadd.f32 %v860_v30, %v831_v29 }
 0x14a   : > { %v885_v33 = vadd.f32 %v884_v32, %v861_v31 }
 0x14c   : > { %896 = vrot.lane.b32.xlu1 %v885_v33, %s1194_s7 }
 0x18e   : > { %v889_v34 = vpop.permute.xlu2 %888 }
 0x18f   : > { %v900_v36 = vsel %vm899_vm5, %v342_v1, %v889_v34 }
 0x19a   : > { %v893_v35 = vpop.permute.xlu2 %892 }
 0x19b   : > { %v902_v37 = vsel %vm901_vm6, %v900_v36, %v893_v35 }
 0x1be   : > { %v897_v38 = vpop.permute.xlu1 %896 }
 0x1bf   : > { %v904_v39 = vsel %vm903_vm7, %v902_v37, %v897_v38 }
 0x1c0   : > { %905 = vst [vmem:[%s151_s23] sm:$0xff] %v904_v39 }
 0x1c1   : > { %1143 = shalt.err (!%p1140_p8)
}
 0x1c2   : > { %1025 = dma.vmem_to_hbm [thread:$0]  (%p1248_p5), %s920_s24, 128, %s922_s25, %s907_s13  }
 0x1c3 PF: > { %p1037_p9 = scmp.ge.s32.totalorder %s1182_s12, 2  ;;  %s933_s5 = sand.u32 1, %s1170_s9  }
 0x1c4   : > { %s934_s6 = scalar_lea.sflag [#allocation4], %s933_s5 }
 0x1c5   : > { %p1032_p10 = pnand %p1037_p9, %p1252_p6 }
 0x1c7   : > { %p1033_p11 = pneg %p1032_p10 }
 0x1c9   : > { %1165 = dma.done.wait (%p1033_p11), %s934_s6, 128  }
 0x1ca   : > { %1167 = vsyncadd (%p1033_p11), %s934_s6, 4294967168  ;;  %p13_p12 = scmp.ge.s32.totalorder %s1235_s15, 4   ;;  %s1440_s9 = smov %s1174_s10 }
 0x1cb   : > { %s1441_s10 = smov %s1178_s11  ;;  %s1442_s11 = smov %s1246_s18 }
 0x1cc   : > { %s1443_s12 = smov %s1235_s15  ;;  %15 = sbr.rel (!%p13_p12) target bundleno = 4 (0x4), region = 68 }
 0x1d1   :  { %940 = vsyncpa [#allocation3], 1 }
 0x1d2   :  { %942 = vsyncpa [#allocation3 + $0x1], 1 }
 0x1d3   :  { %943 = vsyncpa [#allocation4], 1 }
 0x1d4   :  { %945 = vsyncpa [#allocation4 + $0x1], 1 }

</bundles_post_ra>
